<compile_context>
chip_gen: v6e
topology: v6e:2x2x1
jax: 0.10.0
libtpu: 0.0.40
codegen_flags: <defaults>
</compile_context>

<pallas_src>
import functools
import math

import jax
import jax.numpy as jnp
from jax import lax
from jax.experimental import pallas as pl
from jax.experimental.pallas import tpu as pltpu


# ----------------------------- Pallas kernel ---------------------------------

def relation_kernel(x_ref,
                    m1a_ref, p1a_ref, selE1_ref,
                    m1b_ref, p1b_ref, selE2_ref,
                    w1_ref, s1_ref, t1_ref,
                    w2_ref, s2_ref, t2_ref,
                    fc1wT_ref, fc1b_ref, fc2wT_ref, fc2b_ref,
                    out_ref, *, approx_sigmoid):
    op_dt = w1_ref.dtype          # MXU operand dtype (f32 or bf16); accumulation f32
    x = x_ref[...]                # (Cin_p, TB*L) f32, lane n = b*L + l (b-major)

    def conv_bn_relu_pool(inp, m_m1, m_p1, selE, wf, scale, shift):
        # inp: (C, N) f32, lane n = b*Lseg + l (b-major).
        N = inp.shape[1]
        # +/-1 in-sample shifts: XLU roll + (1, N) boundary mask (no O(N^2) consts).
        x_m1 = pltpu.roll(inp, shift=1, axis=1) * m_m1        # x[l-1], 0 at l == 0
        x_p1 = pltpu.roll(inp, shift=N - 1, axis=1) * m_p1    # x[l+1], 0 at l == L-1
        # Fused 3-tap Conv1d: a single MXU matmul over K = 3*C.
        xcat = jnp.concatenate([x_m1, inp, x_p1], axis=0).astype(op_dt)
        y = jnp.dot(wf, xcat, preferred_element_type=jnp.float32)
        # Folded BatchNorm (conv bias folded into `shift`) + ReLU, f32 on the VPU.
        y = jnp.maximum(y * scale + shift, 0.0)
        # MaxPool1d(2): roll + max, then ONE even-lane compaction matmul.
        ymax = jnp.maximum(y, pltpu.roll(y, shift=N - 1, axis=1))
        return jnp.dot(ymax.astype(op_dt), selE, preferred_element_type=jnp.float32)

    h1 = conv_bn_relu_pool(x, m1a_ref[...], p1a_ref[...], selE1_ref[...],
                           w1_ref[...], s1_ref[...], t1_ref[...])   # (C_p, TB*L/2) b-major
    h2 = conv_bn_relu_pool(h1, m1b_ref[...], p1b_ref[...], selE2_ref[...],
                           w2_ref[...], s2_ref[...], t2_ref[...])   # (C_p, L4*TB) l-major

    # FC1: z[h, b] = sum_{c,l} fc1w[c*L4+l, h] * h2[c, l*TB+b]
    # -> short sum of (H, C_p) @ (C_p, TB) matmuls over static lane slices
    #    (slices are 128-aligned whenever TB is a multiple of 128).
    TB = out_ref.shape[1]
    L4 = h2.shape[1] // TB
    h2o = h2.astype(op_dt)
    acc = jnp.dot(fc1wT_ref[0], h2o[:, 0:TB], preferred_element_type=jnp.float32)
    for l in range(1, L4):
        acc = acc + jnp.dot(fc1wT_ref[l], h2o[:, l * TB:(l + 1) * TB],
                            preferred_element_type=jnp.float32)
    zT = jnp.maximum(acc + fc1b_ref[...], 0.0)                      # (H, TB) f32

    oT = jnp.dot(fc2wT_ref[...], zT.astype(op_dt),
                 preferred_element_type=jnp.float32) + fc2b_ref[...]  # (1, TB)
    # Sigmoid; approx=True routes the divide to the EUP vrcp slot (perf mode).
    out_ref[...] = pl.reciprocal(1.0 + jnp.exp(-oT), approx=approx_sigmoid)


# ------------------------------ host helpers ----------------------------------

def _round_up(v, m):
    return ((v + m - 1) // m) * m


def _full_spec(a):
    zeros = (0,) * a.ndim
    return pl.BlockSpec(a.shape, lambda i, _z=zeros: _z)


def _build_consts(TB, L, op_dtype):
    """Per-block boundary masks + even-lane pooling compactions (built once, host)."""
    f32 = jnp.float32
    L2, L4 = L // 2, L // 4
    # ---- block 1: lanes b-major, segment length L ----
    N1 = TB * L
    j1 = jnp.arange(N1)
    m1a = ((j1 % L) != 0).astype(f32).reshape(1, N1)         # kill x[l-1] at l == 0
    p1a = ((j1 % L) != (L - 1)).astype(f32).reshape(1, N1)   # kill x[l+1] at l == L-1
    k1 = jnp.arange(TB * L2)                                 # pooled lane m = b*L2 + p
    selE1 = (j1[:, None] == ((k1 // L2) * L + 2 * (k1 % L2))[None, :]).astype(op_dtype)
    # ---- block 2: lanes b-major, segment L2; pooled output emitted l-major ----
    N2 = TB * L2
    j2 = jnp.arange(N2)
    m1b = ((j2 % L2) != 0).astype(f32).reshape(1, N2)
    p1b = ((j2 % L2) != (L2 - 1)).astype(f32).reshape(1, N2)
    k2 = jnp.arange(L4 * TB)                                 # pooled lane k = l*TB + b
    selE2 = (j2[:, None] == ((k2 % TB) * L2 + 2 * (k2 // TB))[None, :]).astype(op_dtype)
    return (m1a, p1a, selE1, m1b, p1b, selE2)


def relation_net_forward(x, kparams, *, tb=None, approx_sigmoid=None):
    B, cin2, L = x.shape
    assert L % 4 == 0, "two MaxPool(2) stages require L % 4 == 0"
    (w1f, s1, t1f, w2f, s2, t2f, fc1wT, fc1b, fc2wT, fc2b) = kparams
    cinp = w1f.shape[1] // 3            # padded conv-1 input channels
    op_dt = w1f.dtype
    if approx_sigmoid is None:
        approx_sigmoid = (op_dt == jnp.bfloat16)

    # Batch tile TB:
    #  * TB*L is a multiple of 256, so both rolled lane extents (TB*L, TB*L/2) are
    #    multiples of 128 (lane-dense vregs, aligned stores).
    #  * Multi-block case uses TB = 128 (multiple of 128), so the per-step x and
    #    output blocks satisfy the (8,128) rule, the output store is unmasked, and
    #    the "parallel" grid axis shards across v7x's two TensorCores (nblk >= 2).
    lane_unit = 256 // math.gcd(L, 256)
    if tb is not None:
        TB = tb
    else:
        tb_single = max(lane_unit, _round_up(B, lane_unit))
        TB = tb_single if tb_single * L <= 2048 else _round_up(128, lane_unit)
    nblk = -(-B // TB)
    Bp = nblk * TB
    if nblk > 1:
        assert TB % 128 == 0, "multi-block tiling requires TB to be a multiple of 128"

    # Pad channels to the packed-weight channel count, pad batch to a TB multiple.
    if cinp != cin2:
        x = jnp.concatenate([x, jnp.zeros((B, cinp - cin2, L), x.dtype)], axis=1)
    if Bp != B:
        x = jnp.concatenate([x, jnp.zeros((Bp - B, cinp, L), x.dtype)], axis=0)
    # (Cin_p, Bp*L): lane index = b*L + l (b-major).
    x_packed = jnp.transpose(x, (1, 0, 2)).reshape(cinp, Bp * L).astype(jnp.float32)

    consts = _build_consts(TB, L, op_dt)
    ins = (x_packed,) + consts + tuple(kparams)
    in_specs = [pl.BlockSpec((cinp, TB * L), lambda i: (0, i))]
    in_specs += [_full_spec(a) for a in consts + tuple(kparams)]

    kernel = functools.partial(relation_kernel, approx_sigmoid=approx_sigmoid)
    out = pl.pallas_call(
        kernel,
        out_shape=jax.ShapeDtypeStruct((1, Bp), jnp.float32),
        grid_spec=pltpu.PrefetchScalarGridSpec(
            num_scalar_prefetch=0,
            grid=(nblk,),
            in_specs=in_specs,
            out_specs=pl.BlockSpec((1, TB), lambda i: (0, i)),   # lane-dense output slab
        ),
        compiler_params=pltpu.CompilerParams(
            dimension_semantics=("parallel",),
            vmem_limit_bytes=32 * 1024 * 1024),
    )(*ins)
    return out[0, :B].reshape(B, 1)


# ------------------------- parameter construction ----------------------------

def init_params(key, hidden_chn, L, h_size, *, dtype=jnp.float32, eps=1e-5):
    C = hidden_chn
    cin = 2 * C
    L4 = L // 4
    embed = C * L4
    ks = jax.random.split(key, 16)

    def bn_fold(kg, kb, km, kv, n):
        gamma = 1.0 + 0.1 * jax.random.normal(kg, (n, 1), jnp.float32)
        beta = 0.1 * jax.random.normal(kb, (n, 1), jnp.float32)
        mean = 0.1 * jax.random.normal(km, (n, 1), jnp.float32)
        var = 0.5 + jnp.abs(jax.random.normal(kv, (n, 1), jnp.float32))
        scale = gamma / jnp.sqrt(var + eps)
        shift = beta - mean * scale
        return scale, shift

    w1 = 0.1 * jax.random.normal(ks[0], (C, cin, 3), jnp.float32)
    b1 = 0.1 * jax.random.normal(ks[1], (C, 1), jnp.float32)
    s1, t1 = bn_fold(ks[2], ks[3], ks[4], ks[5], C)

    w2 = 0.1 * jax.random.normal(ks[6], (C, C, 3), jnp.float32)
    b2 = 0.1 * jax.random.normal(ks[7], (C, 1), jnp.float32)
    s2, t2 = bn_fold(ks[8], ks[9], ks[10], ks[11], C)

    fc1w = 0.1 * jax.random.normal(ks[12], (embed, h_size), jnp.float32)  # x @ W + b
    fc1b = 0.1 * jax.random.normal(ks[13], (h_size,), jnp.float32)
    fc2w = 0.1 * jax.random.normal(ks[14], (h_size, 1), jnp.float32)
    fc2b = 0.1 * jax.random.normal(ks[15], (1, 1), jnp.float32)

    raw = dict(w1=w1, b1=b1, s1=s1, t1=t1, w2=w2, b2=b2, s2=s2, t2=t2,
               fc1w=fc1w, fc1b=fc1b, fc2w=fc2w, fc2b=fc2b)

    # ---------------- kernel-side packing (done once, outside the kernel) -------
    def pad_to(a, n, axis):
        if a.shape[axis] == n:
            return a
        pad = [(0, 0)] * a.ndim
        pad[axis] = (0, n - a.shape[axis])
        return jnp.pad(a, pad)

    cin_p = _round_up(cin, 8)
    C_p = _round_up(C, 8)

    # Fused conv weights: (Cout_p, 3*Cin_p), column blocks = [tap-1 | tap 0 | tap+1].
    w1_p = pad_to(pad_to(w1, C_p, 0), cin_p, 1)
    w1f = jnp.transpose(w1_p, (0, 2, 1)).reshape(C_p, 3 * cin_p)
    w2_p = pad_to(pad_to(w2, C_p, 0), C_p, 1)
    w2f = jnp.transpose(w2_p, (0, 2, 1)).reshape(C_p, 3 * C_p)

    # BN scale / shift with the conv bias folded in; padded channels -> 0.
    s1_p = pad_to(s1, C_p, 0)
    t1f = pad_to(b1 * s1 + t1, C_p, 0)
    s2_p = pad_to(s2, C_p, 0)
    t2f = pad_to(b2 * s2 + t2, C_p, 0)

    # FC1 weight as (L4, H, C_p): fc1wT[l, h, c] = fc1w[c*L4 + l, h].
    fc1w_3d = pad_to(fc1w.reshape(C, L4, h_size), C_p, 0)
    fc1wT = jnp.transpose(fc1w_3d, (1, 2, 0))
    fc1b_col = fc1b.reshape(h_size, 1)
    fc2wT = jnp.transpose(fc2w)                     # (1, H)

    kparams = (w1f.astype(dtype), s1_p, t1f, w2f.astype(dtype), s2_p, t2f,
               fc1wT.astype(dtype), fc1b_col, fc2wT.astype(dtype), fc2b)
    return kparams, raw


# ------------------------------ JAX reference ---------------------------------

def reference_forward(x, raw):
    def conv1d(inp, w, b):  # inp (B, Cin, L), w (Cout, Cin, 3)
        return lax.conv_general_dilated(
            inp, w, window_strides=(1,), padding=((1, 1),),
            dimension_numbers=("NCH", "OIH", "NCH")) + b[None, :, :]

    def block(inp, w, b, s, t):
        y = conv1d(inp, w, b)
        y = y * s[None, :, :] + t[None, :, :]
        y = jnp.maximum(y, 0.0)
        B, Co, L = y.shape
        return jnp.max(y.reshape(B, Co, L // 2, 2), axis=-1)

    h = block(x, raw["w1"], raw["b1"], raw["s1"], raw["t1"])
    h = block(h, raw["w2"], raw["b2"], raw["s2"], raw["t2"])
    flat = h.reshape(h.shape[0], -1)
    z = jnp.maximum(flat @ raw["fc1w"] + raw["fc1b"], 0.0)
    o = z @ raw["fc2w"] + raw["fc2b"]
    return jax.nn.sigmoid(o)


# ----------------------------------- main -------------------------------------

if __name__ == "__main__":
    B = 2
    hidden_chn = 4          # conv-1 input channels = 2 * hidden_chn = 8
    L = 16                  # sequence length; after two MaxPool(2): L // 4 = 4
    h_size = 32             # embed_size = hidden_chn * (L // 4) = 16

    key = jax.random.PRNGKey(0)
    kx, kp = jax.random.split(key)
    x = jax.random.normal(kx, (B, 2 * hidden_chn, L), jnp.float32)

    # ---- f32 MXU operands + exact-reciprocal sigmoid: tight numerical check ----
    kparams_f32, raw = init_params(kp, hidden_chn, L, h_size, dtype=jnp.float32)
    out_f32 = jax.block_until_ready(relation_net_forward(x, kparams_f32))
    ref = reference_forward(x, raw)
    assert out_f32.shape == (B, 1)
    assert jnp.allclose(out_f32, ref, rtol=1e-4, atol=1e-5), (out_f32, ref)

    # ---- bf16 MXU operands + EUP approx-reciprocal sigmoid (v6e/v7x perf path);
    #      accumulation stays f32, so only a mildly looser tolerance is needed. ----
    kparams_bf16, _ = init_params(kp, hidden_chn, L, h_size, dtype=jnp.bfloat16)
    out_bf16 = jax.block_until_ready(relation_net_forward(x, kparams_bf16))
    assert out_bf16.shape == (B, 1)
    assert jnp.allclose(out_bf16, ref, rtol=2e-2, atol=2e-2), (out_bf16, ref)

    print("KERNEL_OK")
</pallas_src>

<mosaic_0001>
module attributes {stable_mosaic.version = 11 : i64} {
  func.func @relation_kernel(%arg0: i32, %arg1: memref<8x256xf32, #tpu.memory_space<vmem>>, %arg2: memref<1x256xf32, #tpu.memory_space<vmem>>, %arg3: memref<1x256xf32, #tpu.memory_space<vmem>>, %arg4: memref<256x128xf32, #tpu.memory_space<vmem>>, %arg5: memref<1x128xf32, #tpu.memory_space<vmem>>, %arg6: memref<1x128xf32, #tpu.memory_space<vmem>>, %arg7: memref<128x64xf32, #tpu.memory_space<vmem>>, %arg8: memref<8x24xf32, #tpu.memory_space<vmem>>, %arg9: memref<8x1xf32, #tpu.memory_space<vmem>>, %arg10: memref<8x1xf32, #tpu.memory_space<vmem>>, %arg11: memref<8x24xf32, #tpu.memory_space<vmem>>, %arg12: memref<8x1xf32, #tpu.memory_space<vmem>>, %arg13: memref<8x1xf32, #tpu.memory_space<vmem>>, %arg14: memref<4x32x8xf32, #tpu.memory_space<vmem>>, %arg15: memref<32x1xf32, #tpu.memory_space<vmem>>, %arg16: memref<1x32xf32, #tpu.memory_space<vmem>>, %arg17: memref<1x1xf32, #tpu.memory_space<vmem>>, %arg18: memref<1x16xf32, #tpu.memory_space<vmem>>) attributes {dimension_semantics = [#tpu.dimension_semantics<parallel>], iteration_bounds = array<i64: 1>, scalar_prefetch = 0 : i64, scratch_operands = 0 : i64, tpu.core_type = #tpu.core_type<tc>, window_params = [{transform_indices = @transform_0, window_bounds = array<i64: 8, 256>}, {pipeline_mode = #tpu.pipeline_mode<synchronous>, transform_indices = @transform_1, window_bounds = array<i64: 1, 256>}, {pipeline_mode = #tpu.pipeline_mode<synchronous>, transform_indices = @transform_2, window_bounds = array<i64: 1, 256>}, {pipeline_mode = #tpu.pipeline_mode<synchronous>, transform_indices = @transform_3, window_bounds = array<i64: 256, 128>}, {pipeline_mode = #tpu.pipeline_mode<synchronous>, transform_indices = @transform_4, window_bounds = array<i64: 1, 128>}, {pipeline_mode = #tpu.pipeline_mode<synchronous>, transform_indices = @transform_5, window_bounds = array<i64: 1, 128>}, {pipeline_mode = #tpu.pipeline_mode<synchronous>, transform_indices = @transform_6, window_bounds = array<i64: 128, 64>}, {pipeline_mode = #tpu.pipeline_mode<synchronous>, transform_indices = @transform_7, window_bounds = array<i64: 8, 24>}, {pipeline_mode = #tpu.pipeline_mode<synchronous>, transform_indices = @transform_8, window_bounds = array<i64: 8, 1>}, {pipeline_mode = #tpu.pipeline_mode<synchronous>, transform_indices = @transform_9, window_bounds = array<i64: 8, 1>}, {pipeline_mode = #tpu.pipeline_mode<synchronous>, transform_indices = @transform_10, window_bounds = array<i64: 8, 24>}, {pipeline_mode = #tpu.pipeline_mode<synchronous>, transform_indices = @transform_11, window_bounds = array<i64: 8, 1>}, {pipeline_mode = #tpu.pipeline_mode<synchronous>, transform_indices = @transform_12, window_bounds = array<i64: 8, 1>}, {pipeline_mode = #tpu.pipeline_mode<synchronous>, transform_indices = @transform_13, window_bounds = array<i64: 4, 32, 8>}, {pipeline_mode = #tpu.pipeline_mode<synchronous>, transform_indices = @transform_14, window_bounds = array<i64: 32, 1>}, {pipeline_mode = #tpu.pipeline_mode<synchronous>, transform_indices = @transform_15, window_bounds = array<i64: 1, 32>}, {pipeline_mode = #tpu.pipeline_mode<synchronous>, transform_indices = @transform_16, window_bounds = array<i64: 1, 1>}, {transform_indices = @transform_17, window_bounds = array<i64: 1, 16>}]} {
    %c0 = arith.constant 0 : index
    %c0_0 = arith.constant 0 : index
    %0 = vector.load %arg1[%c0, %c0_0] : memref<8x256xf32, #tpu.memory_space<vmem>>, vector<8x256xf32>
    %c0_1 = arith.constant 0 : index
    %c0_2 = arith.constant 0 : index
    %1 = vector.load %arg2[%c0_1, %c0_2] : memref<1x256xf32, #tpu.memory_space<vmem>>, vector<1x256xf32>
    %c0_3 = arith.constant 0 : index
    %c0_4 = arith.constant 0 : index
    %2 = vector.load %arg3[%c0_3, %c0_4] : memref<1x256xf32, #tpu.memory_space<vmem>>, vector<1x256xf32>
    %c0_5 = arith.constant 0 : index
    %c0_6 = arith.constant 0 : index
    %3 = vector.load %arg4[%c0_5, %c0_6] : memref<256x128xf32, #tpu.memory_space<vmem>>, vector<256x128xf32>
    %c0_7 = arith.constant 0 : index
    %c0_8 = arith.constant 0 : index
    %4 = vector.load %arg8[%c0_7, %c0_8] : memref<8x24xf32, #tpu.memory_space<vmem>>, vector<8x24xf32>
    %c0_9 = arith.constant 0 : index
    %c0_10 = arith.constant 0 : index
    %5 = vector.load %arg9[%c0_9, %c0_10] : memref<8x1xf32, #tpu.memory_space<vmem>>, vector<8x1xf32>
    %c0_11 = arith.constant 0 : index
    %c0_12 = arith.constant 0 : index
    %6 = vector.load %arg10[%c0_11, %c0_12] : memref<8x1xf32, #tpu.memory_space<vmem>>, vector<8x1xf32>
    %c1_i32 = arith.constant 1 : i32
    %7 = tpu.dynamic_rotate %0 by %c1_i32 dim 1 : vector<8x256xf32>, i32 -> vector<8x256xf32>
    %8 = vector.broadcast %1 : vector<1x256xf32> to vector<8x256xf32>
    %9 = arith.mulf %7, %8 : vector<8x256xf32>
    %c255_i32 = arith.constant 255 : i32
    %10 = tpu.dynamic_rotate %0 by %c255_i32 dim 1 : vector<8x256xf32>, i32 -> vector<8x256xf32>
    %11 = vector.broadcast %2 : vector<1x256xf32> to vector<8x256xf32>
    %12 = arith.mulf %10, %11 : vector<8x256xf32>
    %13 = tpu.concatenate %9, %0, %12 in 0 : vector<8x256xf32>, vector<8x256xf32>, vector<8x256xf32> -> vector<24x256xf32>
    %cst = arith.constant dense<0.000000e+00> : vector<8x256xf32>
    %14 = tpu.matmul %4, %13, %cst {dimension_numbers = #tpu.dot_dimension_numbers<[1], [0], [0], [1], [0, 0, 1, 1], [], []>} : vector<8x24xf32>, vector<24x256xf32>, vector<8x256xf32> -> vector<8x256xf32>
    %15 = vector.broadcast %5 : vector<8x1xf32> to vector<8x256xf32>
    %16 = arith.mulf %14, %15 : vector<8x256xf32>
    %17 = vector.broadcast %6 : vector<8x1xf32> to vector<8x256xf32>
    %18 = arith.addf %16, %17 : vector<8x256xf32>
    %cst_13 = arith.constant 0.000000e+00 : f32
    %19 = vector.broadcast %cst_13 : f32 to vector<8x256xf32>
    %20 = arith.maximumf %18, %19 : vector<8x256xf32>
    %c255_i32_14 = arith.constant 255 : i32
    %21 = tpu.dynamic_rotate %20 by %c255_i32_14 dim 1 : vector<8x256xf32>, i32 -> vector<8x256xf32>
    %22 = arith.maximumf %20, %21 : vector<8x256xf32>
    %cst_15 = arith.constant dense<0.000000e+00> : vector<8x128xf32>
    %23 = tpu.matmul %22, %3, %cst_15 {dimension_numbers = #tpu.dot_dimension_numbers<[1], [0], [0], [1], [0, 0, 1, 1], [], []>} : vector<8x256xf32>, vector<256x128xf32>, vector<8x128xf32> -> vector<8x128xf32>
    %c0_16 = arith.constant 0 : index
    %c0_17 = arith.constant 0 : index
    %24 = vector.load %arg5[%c0_16, %c0_17] : memref<1x128xf32, #tpu.memory_space<vmem>>, vector<1x128xf32>
    %c0_18 = arith.constant 0 : index
    %c0_19 = arith.constant 0 : index
    %25 = vector.load %arg6[%c0_18, %c0_19] : memref<1x128xf32, #tpu.memory_space<vmem>>, vector<1x128xf32>
    %c0_20 = arith.constant 0 : index
    %c0_21 = arith.constant 0 : index
    %26 = vector.load %arg7[%c0_20, %c0_21] : memref<128x64xf32, #tpu.memory_space<vmem>>, vector<128x64xf32>
    %c0_22 = arith.constant 0 : index
    %c0_23 = arith.constant 0 : index
    %27 = vector.load %arg11[%c0_22, %c0_23] : memref<8x24xf32, #tpu.memory_space<vmem>>, vector<8x24xf32>
    %c0_24 = arith.constant 0 : index
    %c0_25 = arith.constant 0 : index
    %28 = vector.load %arg12[%c0_24, %c0_25] : memref<8x1xf32, #tpu.memory_space<vmem>>, vector<8x1xf32>
    %c0_26 = arith.constant 0 : index
    %c0_27 = arith.constant 0 : index
    %29 = vector.load %arg13[%c0_26, %c0_27] : memref<8x1xf32, #tpu.memory_space<vmem>>, vector<8x1xf32>
    %c1_i32_28 = arith.constant 1 : i32
    %30 = tpu.dynamic_rotate %23 by %c1_i32_28 dim 1 : vector<8x128xf32>, i32 -> vector<8x128xf32>
    %31 = vector.broadcast %24 : vector<1x128xf32> to vector<8x128xf32>
    %32 = arith.mulf %30, %31 : vector<8x128xf32>
    %c127_i32 = arith.constant 127 : i32
    %33 = tpu.dynamic_rotate %23 by %c127_i32 dim 1 : vector<8x128xf32>, i32 -> vector<8x128xf32>
    %34 = vector.broadcast %25 : vector<1x128xf32> to vector<8x128xf32>
    %35 = arith.mulf %33, %34 : vector<8x128xf32>
    %36 = tpu.concatenate %32, %23, %35 in 0 : vector<8x128xf32>, vector<8x128xf32>, vector<8x128xf32> -> vector<24x128xf32>
    %cst_29 = arith.constant dense<0.000000e+00> : vector<8x128xf32>
    %37 = tpu.matmul %27, %36, %cst_29 {dimension_numbers = #tpu.dot_dimension_numbers<[1], [0], [0], [1], [0, 0, 1, 1], [], []>} : vector<8x24xf32>, vector<24x128xf32>, vector<8x128xf32> -> vector<8x128xf32>
    %38 = vector.broadcast %28 : vector<8x1xf32> to vector<8x128xf32>
    %39 = arith.mulf %37, %38 : vector<8x128xf32>
    %40 = vector.broadcast %29 : vector<8x1xf32> to vector<8x128xf32>
    %41 = arith.addf %39, %40 : vector<8x128xf32>
    %cst_30 = arith.constant 0.000000e+00 : f32
    %42 = vector.broadcast %cst_30 : f32 to vector<8x128xf32>
    %43 = arith.maximumf %41, %42 : vector<8x128xf32>
    %c127_i32_31 = arith.constant 127 : i32
    %44 = tpu.dynamic_rotate %43 by %c127_i32_31 dim 1 : vector<8x128xf32>, i32 -> vector<8x128xf32>
    %45 = arith.maximumf %43, %44 : vector<8x128xf32>
    %cst_32 = arith.constant dense<0.000000e+00> : vector<8x64xf32>
    %46 = tpu.matmul %45, %26, %cst_32 {dimension_numbers = #tpu.dot_dimension_numbers<[1], [0], [0], [1], [0, 0, 1, 1], [], []>} : vector<8x128xf32>, vector<128x64xf32>, vector<8x64xf32> -> vector<8x64xf32>
    %c0_33 = arith.constant 0 : index
    %c0_34 = arith.constant 0 : index
    %c0_35 = arith.constant 0 : index
    %47 = vector.load %arg14[%c0_33, %c0_34, %c0_35] : memref<4x32x8xf32, #tpu.memory_space<vmem>>, vector<1x32x8xf32>
    %48 = vector.shape_cast %47 : vector<1x32x8xf32> to vector<32x8xf32>
    %49 = vector.extract_strided_slice %46 {offsets = [0, 0], sizes = [8, 16], strides = [1, 1]} : vector<8x64xf32> to vector<8x16xf32>
    %cst_36 = arith.constant dense<0.000000e+00> : vector<32x16xf32>
    %50 = tpu.matmul %48, %49, %cst_36 {dimension_numbers = #tpu.dot_dimension_numbers<[1], [0], [0], [1], [0, 0, 1, 1], [], []>} : vector<32x8xf32>, vector<8x16xf32>, vector<32x16xf32> -> vector<32x16xf32>
    %c1 = arith.constant 1 : index
    %c0_37 = arith.constant 0 : index
    %c0_38 = arith.constant 0 : index
    %51 = vector.load %arg14[%c1, %c0_37, %c0_38] : memref<4x32x8xf32, #tpu.memory_space<vmem>>, vector<1x32x8xf32>
    %52 = vector.shape_cast %51 : vector<1x32x8xf32> to vector<32x8xf32>
    %53 = vector.extract_strided_slice %46 {offsets = [0, 16], sizes = [8, 16], strides = [1, 1]} : vector<8x64xf32> to vector<8x16xf32>
    %cst_39 = arith.constant dense<0.000000e+00> : vector<32x16xf32>
    %54 = tpu.matmul %52, %53, %cst_39 {dimension_numbers = #tpu.dot_dimension_numbers<[1], [0], [0], [1], [0, 0, 1, 1], [], []>} : vector<32x8xf32>, vector<8x16xf32>, vector<32x16xf32> -> vector<32x16xf32>
    %55 = arith.addf %50, %54 : vector<32x16xf32>
    %c2 = arith.constant 2 : index
    %c0_40 = arith.constant 0 : index
    %c0_41 = arith.constant 0 : index
    %56 = vector.load %arg14[%c2, %c0_40, %c0_41] : memref<4x32x8xf32, #tpu.memory_space<vmem>>, vector<1x32x8xf32>
    %57 = vector.shape_cast %56 : vector<1x32x8xf32> to vector<32x8xf32>
    %58 = vector.extract_strided_slice %46 {offsets = [0, 32], sizes = [8, 16], strides = [1, 1]} : vector<8x64xf32> to vector<8x16xf32>
    %cst_42 = arith.constant dense<0.000000e+00> : vector<32x16xf32>
    %59 = tpu.matmul %57, %58, %cst_42 {dimension_numbers = #tpu.dot_dimension_numbers<[1], [0], [0], [1], [0, 0, 1, 1], [], []>} : vector<32x8xf32>, vector<8x16xf32>, vector<32x16xf32> -> vector<32x16xf32>
    %60 = arith.addf %55, %59 : vector<32x16xf32>
    %c3 = arith.constant 3 : index
    %c0_43 = arith.constant 0 : index
    %c0_44 = arith.constant 0 : index
    %61 = vector.load %arg14[%c3, %c0_43, %c0_44] : memref<4x32x8xf32, #tpu.memory_space<vmem>>, vector<1x32x8xf32>
    %62 = vector.shape_cast %61 : vector<1x32x8xf32> to vector<32x8xf32>
    %63 = vector.extract_strided_slice %46 {offsets = [0, 48], sizes = [8, 16], strides = [1, 1]} : vector<8x64xf32> to vector<8x16xf32>
    %cst_45 = arith.constant dense<0.000000e+00> : vector<32x16xf32>
    %64 = tpu.matmul %62, %63, %cst_45 {dimension_numbers = #tpu.dot_dimension_numbers<[1], [0], [0], [1], [0, 0, 1, 1], [], []>} : vector<32x8xf32>, vector<8x16xf32>, vector<32x16xf32> -> vector<32x16xf32>
    %65 = arith.addf %60, %64 : vector<32x16xf32>
    %c0_46 = arith.constant 0 : index
    %c0_47 = arith.constant 0 : index
    %66 = vector.load %arg15[%c0_46, %c0_47] : memref<32x1xf32, #tpu.memory_space<vmem>>, vector<32x1xf32>
    %67 = vector.broadcast %66 : vector<32x1xf32> to vector<32x16xf32>
    %68 = arith.addf %65, %67 : vector<32x16xf32>
    %cst_48 = arith.constant 0.000000e+00 : f32
    %69 = vector.broadcast %cst_48 : f32 to vector<32x16xf32>
    %70 = arith.maximumf %68, %69 : vector<32x16xf32>
    %c0_49 = arith.constant 0 : index
    %c0_50 = arith.constant 0 : index
    %71 = vector.load %arg16[%c0_49, %c0_50] : memref<1x32xf32, #tpu.memory_space<vmem>>, vector<1x32xf32>
    %cst_51 = arith.constant dense<0.000000e+00> : vector<1x16xf32>
    %72 = tpu.matmul %71, %70, %cst_51 {dimension_numbers = #tpu.dot_dimension_numbers<[1], [0], [0], [1], [0, 0, 1, 1], [], []>} : vector<1x32xf32>, vector<32x16xf32>, vector<1x16xf32> -> vector<1x16xf32>
    %c0_52 = arith.constant 0 : index
    %c0_53 = arith.constant 0 : index
    %73 = vector.load %arg17[%c0_52, %c0_53] : memref<1x1xf32, #tpu.memory_space<vmem>>, vector<1x1xf32>
    %74 = vector.broadcast %73 : vector<1x1xf32> to vector<1x16xf32>
    %75 = arith.addf %72, %74 : vector<1x16xf32>
    %cst_54 = arith.constant 0.000000e+00 : f32
    %76 = vector.broadcast %cst_54 : f32 to vector<1x16xf32>
    %77 = arith.subf %76, %75 : vector<1x16xf32>
    %78 = math.exp %77 : vector<1x16xf32>
    %cst_55 = arith.constant 1.000000e+00 : f32
    %79 = vector.broadcast %cst_55 : f32 to vector<1x16xf32>
    %80 = arith.addf %79, %78 : vector<1x16xf32>
    %81 = tpu.reciprocal %80 : vector<1x16xf32> -> vector<1x16xf32>
    %c0_56 = arith.constant 0 : index
    %c0_57 = arith.constant 0 : index
    %82 = vector.load %arg18[%c0_56, %c0_57] : memref<1x16xf32, #tpu.memory_space<vmem>>, vector<1x16xf32>
    tpu.vector_store %arg18[%c0_56, %c0_57], %81 {strides = array<i32>} : memref<1x16xf32, #tpu.memory_space<vmem>>, vector<1x16xf32>,
    return
  }
  func.func @transform_0(%arg0: i32) -> (i32, i32) {
    %c0_i32 = arith.constant 0 : i32
    %c0_i32_0 = arith.constant 0 : i32
    return %c0_i32, %arg0 : i32, i32
  }
  func.func @transform_1(%arg0: i32) -> (i32, i32) {
    %c0_i32 = arith.constant 0 : i32
    %c0_i32_0 = arith.constant 0 : i32
    %c0_i32_1 = arith.constant 0 : i32
    return %c0_i32, %c0_i32_0 : i32, i32
  }
  func.func @transform_2(%arg0: i32) -> (i32, i32) {
    %c0_i32 = arith.constant 0 : i32
    %c0_i32_0 = arith.constant 0 : i32
    %c0_i32_1 = arith.constant 0 : i32
    return %c0_i32, %c0_i32_0 : i32, i32
  }
  func.func @transform_3(%arg0: i32) -> (i32, i32) {
    %c0_i32 = arith.constant 0 : i32
    %c0_i32_0 = arith.constant 0 : i32
    %c0_i32_1 = arith.constant 0 : i32
    return %c0_i32, %c0_i32_0 : i32, i32
  }
  func.func @transform_4(%arg0: i32) -> (i32, i32) {
    %c0_i32 = arith.constant 0 : i32
    %c0_i32_0 = arith.constant 0 : i32
    %c0_i32_1 = arith.constant 0 : i32
    return %c0_i32, %c0_i32_0 : i32, i32
  }
  func.func @transform_5(%arg0: i32) -> (i32, i32) {
    %c0_i32 = arith.constant 0 : i32
    %c0_i32_0 = arith.constant 0 : i32
    %c0_i32_1 = arith.constant 0 : i32
    return %c0_i32, %c0_i32_0 : i32, i32
  }
  func.func @transform_6(%arg0: i32) -> (i32, i32) {
    %c0_i32 = arith.constant 0 : i32
    %c0_i32_0 = arith.constant 0 : i32
    %c0_i32_1 = arith.constant 0 : i32
    return %c0_i32, %c0_i32_0 : i32, i32
  }
  func.func @transform_7(%arg0: i32) -> (i32, i32) {
    %c0_i32 = arith.constant 0 : i32
    %c0_i32_0 = arith.constant 0 : i32
    %c0_i32_1 = arith.constant 0 : i32
    return %c0_i32, %c0_i32_0 : i32, i32
  }
  func.func @transform_8(%arg0: i32) -> (i32, i32) {
    %c0_i32 = arith.constant 0 : i32
    %c0_i32_0 = arith.constant 0 : i32
    %c0_i32_1 = arith.constant 0 : i32
    return %c0_i32, %c0_i32_0 : i32, i32
  }
  func.func @transform_9(%arg0: i32) -> (i32, i32) {
    %c0_i32 = arith.constant 0 : i32
    %c0_i32_0 = arith.constant 0 : i32
    %c0_i32_1 = arith.constant 0 : i32
    return %c0_i32, %c0_i32_0 : i32, i32
  }
  func.func @transform_10(%arg0: i32) -> (i32, i32) {
    %c0_i32 = arith.constant 0 : i32
    %c0_i32_0 = arith.constant 0 : i32
    %c0_i32_1 = arith.constant 0 : i32
    return %c0_i32, %c0_i32_0 : i32, i32
  }
  func.func @transform_11(%arg0: i32) -> (i32, i32) {
    %c0_i32 = arith.constant 0 : i32
    %c0_i32_0 = arith.constant 0 : i32
    %c0_i32_1 = arith.constant 0 : i32
    return %c0_i32, %c0_i32_0 : i32, i32
  }
  func.func @transform_12(%arg0: i32) -> (i32, i32) {
    %c0_i32 = arith.constant 0 : i32
    %c0_i32_0 = arith.constant 0 : i32
    %c0_i32_1 = arith.constant 0 : i32
    return %c0_i32, %c0_i32_0 : i32, i32
  }
  func.func @transform_13(%arg0: i32) -> (i32, i32, i32) {
    %c0_i32 = arith.constant 0 : i32
    %c0_i32_0 = arith.constant 0 : i32
    %c0_i32_1 = arith.constant 0 : i32
    %c0_i32_2 = arith.constant 0 : i32
    return %c0_i32, %c0_i32_0, %c0_i32_1 : i32, i32, i32
  }
  func.func @transform_14(%arg0: i32) -> (i32, i32) {
    %c0_i32 = arith.constant 0 : i32
    %c0_i32_0 = arith.constant 0 : i32
    %c0_i32_1 = arith.constant 0 : i32
    return %c0_i32, %c0_i32_0 : i32, i32
  }
  func.func @transform_15(%arg0: i32) -> (i32, i32) {
    %c0_i32 = arith.constant 0 : i32
    %c0_i32_0 = arith.constant 0 : i32
    %c0_i32_1 = arith.constant 0 : i32
    return %c0_i32, %c0_i32_0 : i32, i32
  }
  func.func @transform_16(%arg0: i32) -> (i32, i32) {
    %c0_i32 = arith.constant 0 : i32
    %c0_i32_0 = arith.constant 0 : i32
    %c0_i32_1 = arith.constant 0 : i32
    return %c0_i32, %c0_i32_0 : i32, i32
  }
  func.func @transform_17(%arg0: i32) -> (i32, i32) {
    %c0_i32 = arith.constant 0 : i32
    %c0_i32_0 = arith.constant 0 : i32
    return %c0_i32, %arg0 : i32, i32
  }
}

</mosaic_0001>

<bundles_post_ra>
// kernel: tpu_custom_call.1
= control target key start
LH: loop header
LB: loop body
LE: loop exit
PB: predicated region body
PF: predicated region fallthrough
CT: control target
= control target key end

     0   :  { %s1735_s0 = inlined_call_operand.vmem [shape: f32[8,256], index: 0, kind: input, shape index: {}]   ;;  %s1736_s1 = inlined_call_operand.vmem [shape: f32[1,256], index: 1, kind: input, shape index: {}]   ;;  %s1737_s2 = inlined_call_operand.vmem [shape: f32[1,256], index: 2, kind: input, shape index: {}]   ;;  %s1738_s3 = inlined_call_operand.vmem [shape: f32[256,128], index: 3, kind: input, shape index: {}]   ;;  %s1739_s4 = inlined_call_operand.vmem [shape: f32[1,128], index: 4, kind: input, shape index: {}]   ;;  %s1740_s5 = inlined_call_operand.vmem [shape: f32[1,128], index: 5, kind: input, shape index: {}]   ;;  %s1741_s6 = inlined_call_operand.vmem [shape: f32[128,64], index: 6, kind: input, shape index: {}]   ;;  %s1742_s7 = inlined_call_operand.vmem [shape: f32[8,24], index: 7, kind: input, shape index: {}]   ;;  %s1743_s8 = inlined_call_operand.vmem [shape: f32[8,1], index: 8, kind: input, shape index: {}]   ;;  %s1744_s9 = inlined_call_operand.vmem [shape: f32[8,1], index: 9, kind: input, shape index: {}]   ;;  %s1745_s10 = inlined_call_operand.vmem [shape: f32[8,24], index: 10, kind: input, shape index: {}]   ;;  %s1746_s11 = inlined_call_operand.vmem [shape: f32[8,1], index: 11, kind: input, shape index: {}]   ;;  %s1747_s12 = inlined_call_operand.vmem [shape: f32[8,1], index: 12, kind: input, shape index: {}]   ;;  %s1748_s13 = inlined_call_operand.vmem [shape: f32[4,32,8], index: 13, kind: input, shape index: {}]   ;;  %s1749_s14 = inlined_call_operand.vmem [shape: f32[32,1], index: 14, kind: input, shape index: {}]   ;;  %s1750_s15 = inlined_call_operand.vmem [shape: f32[1,32], index: 15, kind: input, shape index: {}]   ;;  %s1751_s16 = inlined_call_operand.<no memory space> [shape: f32[1,1], index: 16, kind: input, shape index: {}]   ;;  %s1752_s17 = inlined_call_operand.hbm [shape: f32[1,16], index: 17, kind: output, shape index: {}]  }
   0x1   :  { %1754 = sst [smem:[#allocation6_spill]] %s1735_s0  ;;  %v22_v0 = vstv %s1751_s16 }
   0x2   :  { %1755 = sst [smem:[#allocation7_spill]] %s1736_s1  ;;  %23 = vst [vmem:[#allocation2] sm:$0x1] %v22_v0 }
   0x3   :  { %s1756_s28 = sld [smem:[#allocation6_spill]]  ;;  %s1314_s29 = smov 1   ;;  %v1316_v3 = vmov 0.0   ;;  %v1317_v4 = vmov 0  }
   0x4   :  { %s1315_s0 = smov 127   ;;  %208 = vmatprep.mubr.f32.mxu0 %v1316_v3  ;;  %1281 = vset.pattern.permute.xlu0 %v1317_v4 }
   0x9   :  { %v59_v1 = vld [vmem:[%s1756_s28] sm:$0xff]  ;;  %v60_v2 = vld [vmem:[%s1756_s28 + $0x8] sm:$0xff] }
   0xa   :  { %98 = vrot.lane.b32.xlu1 %v59_v1, %s1314_s29  ;;  %120 = vrot.lane.b32.xlu0 %v59_v1, %s1315_s0 }
   0xb   :  { %24 = vsyncpa [#allocation4], 0  ;;  %1282 = vset.pattern.permute.xlu1 %v1317_v4  ;;  %v96_v5 = vld [vmem:[%s1743_s8] sm:$0xff]  ;;  %v102_v7 = vlaneseq  ;;  %s1757_s23 = sld [smem:[#allocation7_spill]]  ;;  %vm140_vm2 = vcmask 195584   ;;  %v94_v31 = vld [vmem:[%s1738_s3 + $0xf8] sm:$0xff] }
   0xc   :  { %v97_v6 = vld [vmem:[%s1744_s9] sm:$0xff]  ;;  %v78_v32 = vld [vmem:[%s1738_s3 + $0x78] sm:$0xff]  ;;  %v93_v33 = vld [vmem:[%s1738_s3 + $0xf0] sm:$0xff]  ;;  %1104 = vmatprep.subr.mxu1 %v94_v31  ;;  %vm1318_vm3 = vmmov 0   ;;  %vm520_vm4 = vcmask 64512   ;;  %s1319_s18 = smov 96  }
   0xd   :  { %v109_v8 = vshrl.u32 %v102_v7, 7  ;;  %v1433_v9 = vand.u32 127, %v102_v7  ;;  %v62_v12 = vld [vmem:[%s1737_s2] sm:$0x3]  ;;  %v77_v34 = vld [vmem:[%s1738_s3 + $0x70] sm:$0xff]  ;;  %1105 = vmatpush3.msra.mxu1 %v78_v32  ;;  %v92_v35 = vld [vmem:[%s1738_s3 + $0xe8] sm:$0xff] }
   0xe   :  { %100 = vrot.lane.b32.xlu1 %v60_v2, %s1314_s29  ;;  %122 = vrot.lane.b32.xlu0 %v60_v2, %s1315_s0  ;;  %v95_v30 = vld [vmem:[%s1742_s7] sm:$0xff]  ;;  %v76_v36 = vld [vmem:[%s1738_s3 + $0x68] sm:$0xff]  ;;  %s1321_s19 = smov 80   ;;  %vm976_vm5 = vcmask 261120   ;;  %vm1055_vm6 = vcmask 122880  }
   0xf   :  { %v1435_v10 = vsub.s32 0, %v109_v8  ;;  %v114_v11 = vsub.s32 1, %v109_v8  ;;  %vm124_vm0 = vcmp.lt.s32.totalorder %v1433_v9, 127  ;;  %vm104_vm1 = vcmp.lt.s32.totalorder %v1433_v9, 1  ;;  %1106 = vmatprep.subr.mxu1 %v93_v33  ;;  %v91_v37 = vld [vmem:[%s1738_s3 + $0xe0] sm:$0xff]  ;;  %v90_v39 = vld [vmem:[%s1738_s3 + $0xd8] sm:$0xff] }
  0x10   :  { %1107 = vmatpush3.msra.mxu1 %v77_v34  ;;  %v75_v38 = vld [vmem:[%s1738_s3 + $0x60] sm:$0xff]  ;;  %v74_v40 = vld [vmem:[%s1738_s3 + $0x58] sm:$0xff]  ;;  %v89_v41 = vld [vmem:[%s1738_s3 + $0xd0] sm:$0xff] }
  0x11   :  { %v135_v15 = vrot.slane %v62_v12, %v114_v11  ;;  %v131_v16 = vrot.slane %v62_v12, %v1435_v10  ;;  %v61_v17 = vld [vmem:[%s1757_s23] sm:$0x3]  ;;  %1108 = vmatprep.subr.mxu1 %v92_v35  ;;  %v73_v42 = vld [vmem:[%s1738_s3 + $0x50] sm:$0xff]  ;;  %v88_v43 = vld [vmem:[%s1738_s3 + $0xc8] sm:$0xff]  ;;  %s1322_s23 = smov [#allocation3]  }
  0x12   :  { %217 = vperm.xlu0 %1281, %v96_v5   ;;  %224 = vperm.xlu1 %1282, %v97_v6   ;;  %v115_v22 = vrot.slane %v61_v17, %v114_v11  ;;  %v111_v25 = vrot.slane %v61_v17, %v1435_v10  ;;  %v72_v44 = vld [vmem:[%s1738_s3 + $0x48] sm:$0xff]  ;;  %v87_v45 = vld [vmem:[%s1738_s3 + $0xc0] sm:$0xff]  ;;  %v86_v47 = vld [vmem:[%s1738_s3 + $0xb8] sm:$0xff] }
  0x13   :  { %1109 = vmatpush3.msra.mxu1 %v76_v36  ;;  %v71_v46 = vld [vmem:[%s1738_s3 + $0x40] sm:$0xff]  ;;  %v70_v48 = vld [vmem:[%s1738_s3 + $0x38] sm:$0xff]  ;;  %v85_v49 = vld [vmem:[%s1738_s3 + $0xb0] sm:$0xff] }
  0x14   :  { %1110 = vmatprep.subr.mxu1 %v91_v37  ;;  %v69_v50 = vld [vmem:[%s1738_s3 + $0x30] sm:$0xff]  ;;  %v84_v51 = vld [vmem:[%s1738_s3 + $0xa8] sm:$0xff]  ;;  %v83_v53 = vld [vmem:[%s1738_s3 + $0xa0] sm:$0xff] }
  0x15   :  { %1111 = vmatpush3.msra.mxu1 %v75_v38  ;;  %v68_v52 = vld [vmem:[%s1738_s3 + $0x28] sm:$0xff]  ;;  %v67_v54 = vld [vmem:[%s1738_s3 + $0x20] sm:$0xff]  ;;  %v82_v55 = vld [vmem:[%s1738_s3 + $0x98] sm:$0xff] }
  0x16   :  { %1112 = vmatprep.subr.mxu1 %v90_v39  ;;  %v66_v56 = vld [vmem:[%s1738_s3 + $0x18] sm:$0xff]  ;;  %v81_v57 = vld [vmem:[%s1738_s3 + $0x90] sm:$0xff]  ;;  %v80_v60 = vld [vmem:[%s1738_s3 + $0x88] sm:$0xff] }
  0x17   :  { %1113 = vmatpush3.msra.mxu1 %v74_v40  ;;  %v65_v59 = vld [vmem:[%s1738_s3 + $0x10] sm:$0xff]  ;;  %v64_v61 = vld [vmem:[%s1738_s3 + $0x8] sm:$0xff]  ;;  %v79_v62 = vld [vmem:[%s1738_s3 + $0x80] sm:$0xff] }
  0x18   :  { %1114 = vmatprep.subr.mxu1 %v89_v41  ;;  %v329_v9 = vld [vmem:[%s1747_s12] sm:$0xff]  ;;  %v326_v31 = vld [vmem:[%s1741_s6 + $0x78] sm:$0xff]  ;;  %v325_v32 = vld [vmem:[%s1741_s6 + $0x70] sm:$0xff] }
  0x19   :  { %1115 = vmatpush3.msra.mxu1 %v73_v42  ;;  %v324_v33 = vld [vmem:[%s1741_s6 + $0x68] sm:$0xff]  ;;  %v323_v34 = vld [vmem:[%s1741_s6 + $0x60] sm:$0xff]  ;;  %v322_v35 = vld [vmem:[%s1741_s6 + $0x58] sm:$0xff] }
  0x1a   :  { %1116 = vmatprep.subr.mxu1 %v88_v43  ;;  %v321_v36 = vld [vmem:[%s1741_s6 + $0x50] sm:$0xff]  ;;  %v320_v37 = vld [vmem:[%s1741_s6 + $0x48] sm:$0xff]  ;;  %v319_v38 = vld [vmem:[%s1741_s6 + $0x40] sm:$0xff] }
  0x1b   :  { %1117 = vmatpush3.msra.mxu1 %v72_v44  ;;  %v318_v39 = vld [vmem:[%s1741_s6 + $0x38] sm:$0xff]  ;;  %v317_v40 = vld [vmem:[%s1741_s6 + $0x30] sm:$0xff]  ;;  %v316_v41 = vld [vmem:[%s1741_s6 + $0x28] sm:$0xff] }
  0x1c   :  { %1118 = vmatprep.subr.mxu1 %v87_v45  ;;  %v315_v42 = vld [vmem:[%s1741_s6 + $0x20] sm:$0xff]  ;;  %v314_v43 = vld [vmem:[%s1741_s6 + $0x18] sm:$0xff]  ;;  %v313_v44 = vld [vmem:[%s1741_s6 + $0x10] sm:$0xff] }
  0x1d   :  { %1119 = vmatpush3.msra.mxu1 %v71_v46  ;;  %v312_v45 = vld [vmem:[%s1741_s6 + $0x8] sm:$0xff]  ;;  %v311_v46 = vld [vmem:[%s1741_s6] sm:$0xff] }
  0x1e   :  { %1120 = vmatprep.subr.mxu1 %v86_v47 }
  0x1f   :  { %1121 = vmatpush3.msra.mxu1 %v70_v48 }
  0x20   :  { %1122 = vmatprep.subr.mxu1 %v85_v49 }
  0x21   :  { %1123 = vmatpush3.msra.mxu1 %v69_v50 }
  0x22   :  { %1124 = vmatprep.subr.mxu1 %v84_v51 }
  0x23   :  { %1125 = vmatpush3.msra.mxu1 %v68_v52 }
  0x24   :  { %1126 = vmatprep.subr.mxu1 %v83_v53 }
  0x25   :  { %1127 = vmatpush3.msra.mxu1 %v67_v54 }
  0x26   :  { %1128 = vmatprep.subr.mxu1 %v82_v55 }
  0x27   :  { %1129 = vmatpush3.msra.mxu1 %v66_v56  ;;  %v1075_v56 = vld [vmem:[%s1748_s13 + $0x20] sm:$0xff] }
  0x28   :  { %1130 = vmatprep.subr.mxu1 %v81_v57  ;;  %v1087_v57 = vld [vmem:[%s1748_s13 + $0x40] sm:$0xff] }
  0x29   :  { %1131 = vmatpush3.msra.mxu1 %v65_v59 }
  0x2a   :  { %1132 = vmatprep.subr.mxu1 %v80_v60  ;;  %v936_v60 = vld [vmem:[%s1749_s14 + $0x18] sm:$0xff] }
  0x2b   :  { %1133 = vmatpush3.msra.mxu1 %v64_v61  ;;  %v934_v61 = vld [vmem:[%s1749_s14 + $0x8] sm:$0xff] }
  0x2c   :  { %1134 = vmatprep.subr.mxu1 %v79_v62  ;;  %v935_v62 = vld [vmem:[%s1749_s14 + $0x10] sm:$0xff] }
  0x7c   :  { %v99_v13 = vpop.permute.xlu1 %98  ;;  %v121_v14 = vpop.permute.xlu0 %120 }
  0x80   :  { %v101_v18 = vpop.permute.xlu1 %100  ;;  %v123_v19 = vpop.permute.xlu0 %122 }
  0x81   :  { %v125_v20 = vsel %vm124_vm0, %v121_v14, %v123_v19  ;;  %v126_v21 = vsel %vm124_vm0, %v123_v19, %v121_v14  ;;  %v105_v26 = vsel %vm104_vm1, %v99_v13, %v101_v18  ;;  %v106_v27 = vsel %vm104_vm1, %v101_v18, %v99_v13 }
  0x82   :  { %v139_v23 = vmul.f32 %v135_v15, %v126_v21  ;;  %v138_v24 = vmul.f32 %v131_v16, %v125_v20  ;;  %v119_v28 = vmul.f32 %v115_v22, %v105_v26  ;;  %v118_v29 = vmul.f32 %v111_v25, %v106_v27  ;;  %v1072_v27 = vld [vmem:[%s1739_s4] ss:$0 sm:$0xff] }
  0x84   :  { %170 = vmatprep.subr.mxu0 %v139_v23  ;;  %v328_v23 = vld [vmem:[%s1746_s11] sm:$0xff] }
  0x85   :  { %171 = vmatpush1.msra.mxu0 %v138_v24  ;;  %v1073_v24 = vld [vmem:[%s1740_s5] ss:$0 sm:$0xff] }
  0x86   :  { %172 = vmatprep.subr.mxu0 %v60_v2 }
  0x87   :  { %173 = vmatpush1.msra.mxu0 %v59_v1  ;;  %v63_v1 = vld [vmem:[%s1738_s3] sm:$0xff] }
  0x88   :  { %174 = vmatprep.subr.mxu0 %v119_v28  ;;  %1135 = vmatpush3.msra.mxu1 %v63_v1 }
  0x89   :  { %175 = vmatpush1.msra.mxu0 %v118_v29 }
  0x8a   :  { %1071 = vmatmul.mubr.msk.f32.vlgmr.msra.gmra.mxu0 %vm140_vm2, %v95_v30  ;;  %1185 = vmatprep.subr.mxu0 %v1316_v3  ;;  %v327_v30 = vld [vmem:[%s1745_s10] sm:$0xff] }
  0x8b   :  { %1191 = vmatprep.mubr.msk.f32.mxu0 %vm1318_vm3, %v1316_v3 }
  0x8d   :  { %v218_v58 = vpop.permute.xlu0 %217  ;;  %v225_v0 = vpop.permute.xlu1 %224 }
 0x14a   :  { %v210_v63 = vpop.f32.mrf.mxu0 }
 0x14b   :  { %v220_v2 = vmul.f32 %v218_v58, %v210_v63  ;;  %v966_v63 = vld [vmem:[#allocation2] sm:$0x1] }
 0x14c   :  { %v212_v4 = vpop.f32.mrf.mxu0 }
 0x14d   :  { %v227_v5 = vadd.f32 %v225_v0, %v220_v2  ;;  %v221_v6 = vmul.f32 %v218_v58, %v212_v4  ;;  %v1076_v4 = vld [vmem:[%s1748_s13 + $0x28] sm:$0xff] }
 0x14f   :  { %v228_v7 = vadd.f32 %v225_v0, %v221_v6  ;;  %v229_v8 = vmax.f32 %v227_v5, 0.0  ;;  %v933_v0 = vld [vmem:[%s1749_s14] sm:$0xff]  ;;  %v1077_v5 = vld [vmem:[%s1748_s13 + $0x30] sm:$0xff]  ;;  %v1088_v6 = vld [vmem:[%s1748_s13 + $0x48] sm:$0xff] }
 0x151   :  { %v230_v11 = vmax.f32 %v228_v7, 0.0  ;;  %v1089_v7 = vld [vmem:[%s1748_s13 + $0x50] sm:$0xff] }
 0x153   :  { %v1283_v12 = vpack.i.bf16 %v230_v11, %v229_v8 }
 0x155   :  { %1284 = vrot.lane.b32.xlu1 %v1283_v12, %s1315_s0  ;;  %v507_v12 = vld [vmem:[%s1748_s13] sm:$0xff] }
 0x1c7   :  { %v1285_v13 = vpop.permute.xlu1 %1284 }
 0x1c8   :  { %v1287_v14 = vunpack.i.h.bf16 %v1285_v13  ;;  %v1286_v15 = vunpack.i.l.bf16 %v1285_v13  ;;  %v1090_v13 = vld [vmem:[%s1748_s13 + $0x58] sm:$0xff] }
 0x1ca   :  { %v236_v16 = vsel %vm124_vm0, %v1287_v14, %v1286_v15  ;;  %v235_v17 = vsel %vm124_vm0, %v1286_v15, %v1287_v14  ;;  %v508_v14 = vld [vmem:[%s1748_s13 + $0x8] sm:$0xff]  ;;  %v509_v15 = vld [vmem:[%s1748_s13 + $0x10] sm:$0xff] }
 0x1cb   :  { %v238_v18 = vmax.f32 %v230_v11, %v236_v16  ;;  %v237_v19 = vmax.f32 %v229_v8, %v235_v17  ;;  %v1078_v11 = vld [vmem:[%s1748_s13 + $0x38] sm:$0xff]  ;;  %v1095_v17 = vld [vmem:[%s1748_s13 + $0x60] sm:$0xff] }
 0x1cc   :  { %v510_v16 = vld [vmem:[%s1748_s13 + $0x18] sm:$0xff] }
 0x1cd   :  { %303 = vmatprep.mubr.f32.mxu1 %v238_v18  ;;  %v1096_v18 = vld [vmem:[%s1748_s13 + $0x68] sm:$0xff] }
 0x1ce   :  { %304 = vmatmul.mubr.f32.vlgmr.msra.gmra.mxu1 %v237_v19  ;;  %v1097_v19 = vld [vmem:[%s1748_s13 + $0x70] sm:$0xff] }
 0x1cf   :  { %1231 = vmatprep.mubr.msk.f32.mxu1 %vm520_vm4, %v1075_v56 }
 0x28e   :  { %v1136_v20 = vpop.f32.mrf.mxu1 }
 0x290   :  { %v1137_v21 = vpop.f32.mrf.mxu1 }
 0x291   :  { %v1138_v22 = vadd.f32 %v1137_v21, %v1136_v20  ;;  %v1098_v20 = vld [vmem:[%s1748_s13 + $0x78] sm:$0xff] }
 0x293   :  { %330 = vrot.lane.b32.xlu1 %v1138_v22, %s1314_s29  ;;  %339 = vrot.lane.b32.xlu0 %v1138_v22, %s1315_s0  ;;  %s1063_s29 = sshll.u32 %s1322_s23, 4  ;;  %s1064_s29 = int_to_ptr.vmem [resolvable:$true] %s1063_s29 }
 0x294   :  { %s1296_s12 = scalar_lea.vmem %s1064_s29, 32  ;;  %p1297_p1 = scmp.lt.s32.totalorder %s1064_s29, %s1064_s29 }
 0x297   :  { %429 = vperm.xlu1 %1282, %v329_v9   ;;  %423 = vperm.xlu0 %1281, %v328_v23  }
 0x305   :  { %v340_v25 = vpop.permute.xlu0 %339  ;;  %v331_v28 = vpop.permute.xlu1 %330 }
 0x306   :  { %v347_v26 = vmul.f32 %v1073_v24, %v340_v25  ;;  %v338_v29 = vmul.f32 %v1072_v27, %v331_v28 }
 0x308   :  { %1186 = vmatpush3.msra.mxu0 %v347_v26 }
 0x309   :  { %1187 = vmatprep.subr.mxu0 %v1316_v3 }
 0x30a   :  { %1188 = vmatpush3.msra.mxu0 %v1138_v22 }
 0x30b   :  { %1189 = vmatprep.subr.mxu0 %v1316_v3 }
 0x30c   :  { %1190 = vmatpush3.msra.mxu0 %v338_v29 }
 0x30d   :  { %1192 = vmatmul.mubr.msk.f32.vlgmr.msra.gmra.mxu0 %vm140_vm2, %v327_v30  ;;  %1194 = vmatprep.subr.mxu0 %v1316_v3 }
 0x30e   :  { %1226 = vmatprep.mubr.msk.f32.mxu0 %vm1318_vm3, %v1316_v3  ;;  %1195 = vmatpush3.msra.mxu0 %v326_v31 }
 0x30f   :  { %1196 = vmatprep.subr.mxu0 %v1316_v3 }
 0x310   :  { %1197 = vmatpush3.msra.mxu0 %v325_v32 }
 0x311   :  { %1198 = vmatprep.subr.mxu0 %v1316_v3 }
 0x312   :  { %1199 = vmatpush3.msra.mxu0 %v324_v33  ;;  %v424_v47 = vpop.permute.xlu0 %423  ;;  %v430_v50 = vpop.permute.xlu1 %429 }
 0x313   :  { %1200 = vmatprep.subr.mxu0 %v1316_v3 }
 0x314   :  { %1201 = vmatpush3.msra.mxu0 %v323_v34 }
 0x315   :  { %1202 = vmatprep.subr.mxu0 %v1316_v3 }
 0x316   :  { %1203 = vmatpush3.msra.mxu0 %v322_v35 }
 0x317   :  { %1204 = vmatprep.subr.mxu0 %v1316_v3 }
 0x318   :  { %1205 = vmatpush3.msra.mxu0 %v321_v36 }
 0x319   :  { %1206 = vmatprep.subr.mxu0 %v1316_v3 }
 0x31a   :  { %1207 = vmatpush3.msra.mxu0 %v320_v37 }
 0x31b   :  { %1208 = vmatprep.subr.mxu0 %v1316_v3 }
 0x31c   :  { %1209 = vmatpush3.msra.mxu0 %v319_v38 }
 0x31d   :  { %1210 = vmatprep.subr.mxu0 %v1316_v3 }
 0x31e   :  { %1211 = vmatpush3.msra.mxu0 %v318_v39 }
 0x31f   :  { %1212 = vmatprep.subr.mxu0 %v1316_v3 }
 0x320   :  { %1213 = vmatpush3.msra.mxu0 %v317_v40 }
 0x321   :  { %1214 = vmatprep.subr.mxu0 %v1316_v3 }
 0x322   :  { %1215 = vmatpush3.msra.mxu0 %v316_v41 }
 0x323   :  { %1216 = vmatprep.subr.mxu0 %v1316_v3 }
 0x324   :  { %1217 = vmatpush3.msra.mxu0 %v315_v42 }
 0x325   :  { %1218 = vmatprep.subr.mxu0 %v1316_v3 }
 0x326   :  { %1219 = vmatpush3.msra.mxu0 %v314_v43 }
 0x327   :  { %1220 = vmatprep.subr.mxu0 %v1316_v3 }
 0x328   :  { %1221 = vmatpush3.msra.mxu0 %v313_v44 }
 0x329   :  { %1222 = vmatprep.subr.mxu0 %v1316_v3 }
 0x32a   :  { %1223 = vmatpush3.msra.mxu0 %v312_v45 }
 0x32b   :  { %1224 = vmatprep.subr.mxu0 %v1316_v3 }
 0x32c   :  { %1225 = vmatpush3.msra.mxu0 %v311_v46 }
 0x3cd   :  { %v417_v48 = vpop.f32.mrf.mxu0 }
 0x3ce   :  { %v426_v49 = vmul.f32 %v424_v47, %v417_v48 }
 0x3cf   :  { %v1193_v51 = vpop.f32.mrf.mxu0 }
 0x3d0   :  { %v432_v52 = vadd.f32 %v430_v50, %v426_v49 }
 0x3d2   :  { %v433_v53 = vmax.f32 %v432_v52, 0.0 }
 0x3d4   :  { %434 = vrot.lane.b32.xlu0 %v433_v53, %s1315_s0  ;;  %s1320_s0 = smov 112  }
 0x446   :  { %v435_v54 = vpop.permute.xlu0 %434 }
 0x447   :  { %v436_v55 = vmax.f32 %v433_v53, %v435_v54 }
 0x449   :  { %1227 = vmatmul.mubr.f32.vlgmr.msra.gmra.mxu0 %v436_v55 }
 0x44a   :  { %1247 = vmatprep.mubr.msk.f32.mxu0 %vm520_vm4, %v1087_v57 }
 0x509   :  { %v503_v58 = vpop.f32.mrf.mxu0 }
 0x50a   :  { %720 = vrot.lane.b32.xlu0 %v503_v58, %s1319_s18  ;;  %517 = vrot.lane.b32.xlu1 %v503_v58, %s1320_s0 }
 0x50b   :  { %v1228_v59 = vpop.f32.mrf.mxu0 }
 0x50e   :  { %954 = vperm.xlu0 %1281, %v936_v60   ;;  %829 = vrot.lane.b32.xlu1 %v503_v58, %s1321_s19  ;;  %v965_v60 = vld [vmem:[%s1750_s15] sm:$0x1]  ;;  %s1292_s15 = scalar_lea.vmem %s1064_s29, 16 }
 0x50f   :  { %p1293_p0 = scmp.ne.s32.totalorder %s1064_s29, %s1292_s15  ;;  %p1298_p2 = scmp.lt.s32.totalorder %s1296_s12, %s1292_s15 }
 0x511   :  { %p1299_p3 = por %p1298_p2, %p1297_p1 }
 0x512   :  { %944 = vperm.xlu0 %1281, %v934_v61   ;;  %949 = vperm.xlu1 %1282, %v935_v62  }
 0x513   :  { %p1300_p4 = pnand %p1299_p3, %p1293_p0 }
 0x516   :  { %969 = vperm.xlu0 %1281, %v966_v63   ;;  %939 = vperm.xlu1 %1282, %v933_v0  }
 0x57c   :  { %v721_v1 = vpop.permute.xlu0 %720  ;;  %v518_v2 = vpop.permute.xlu1 %517 }
 0x57d   :  { %1229 = vmatprep.subr.mxu1 %v518_v2  ;;  %1245 = vmatprep.subr.mxu0 %v721_v1 }
 0x57e   :  { %1230 = vmatpush3.msra.mxu1 %v518_v2  ;;  %1246 = vmatpush3.msra.mxu0 %v721_v1 }
 0x57f   :  { %1232 = vmatmul.mubr.msk.f32.vlgmr.msra.gmra.mxu1 %vm520_vm4, %v1076_v4  ;;  %1237 = vmatprep.subr.mxu1 %v503_v58 }
 0x580   :  { %1238 = vmatpush3.msra.mxu1 %v503_v58  ;;  %v830_v8 = vpop.permute.xlu1 %829  ;;  %1234 = vmatprep.mubr.msk.f32.mxu1 %vm520_vm4, %v1077_v5 }
 0x581   :  { %1253 = vmatprep.subr.mxu1 %v830_v8  ;;  %1248 = vmatmul.mubr.msk.f32.vlgmr.msra.gmra.mxu0 %vm520_vm4, %v1088_v6 }
 0x582   :  { %1250 = vmatprep.mubr.msk.f32.mxu0 %vm520_vm4, %v1089_v7  ;;  %1261 = vmatprep.subr.mxu0 %v1316_v3 }
 0x583   :  { %1235 = vmatmul.mubr.msk.f32.gmra.mxu1 %vm520_vm4, %v1078_v11 }
 0x584   :  { %1239 = vmatprep.mubr.msk.f32.mxu1 %vm520_vm4, %v507_v12 }
 0x585   :  { %1251 = vmatmul.mubr.msk.f32.gmra.mxu0 %vm520_vm4, %v1090_v13 }
 0x586   :  { %1269 = vmatprep.mubr.msk.f32.mxu0 %vm1318_vm3, %v1316_v3 }
 0x587   :  { %1240 = vmatmul.mubr.msk.f32.vlgmr.msra.gmra.mxu1 %vm520_vm4, %v508_v14 }
 0x588   :  { %1254 = vmatpush3.msra.mxu1 %v830_v8  ;;  %1242 = vmatprep.mubr.msk.f32.mxu1 %vm520_vm4, %v509_v15 }
 0x589   :  { %v955_v34 = vpop.permute.xlu0 %954 }
 0x58b   :  { %1243 = vmatmul.mubr.msk.f32.gmra.mxu1 %vm520_vm4, %v510_v16 }
 0x58c   :  { %1255 = vmatprep.mubr.msk.f32.mxu1 %vm520_vm4, %v1095_v17 }
 0x58d   :  { %v950_v41 = vpop.permute.xlu1 %949  ;;  %v945_v51 = vpop.permute.xlu0 %944 }
 0x58f   :  { %1256 = vmatmul.mubr.msk.f32.vlgmr.msra.gmra.mxu1 %vm520_vm4, %v1096_v18 }
 0x590   :  { %1258 = vmatprep.mubr.msk.f32.mxu1 %vm520_vm4, %v1097_v19 }
 0x591   :  { %v940_v55 = vpop.permute.xlu1 %939  ;;  %v970_v61 = vpop.permute.xlu0 %969 }
 0x592   :  { %v975_v62 = vrot.slane %v970_v61, %v1435_v10 }
 0x593   :  { %1259 = vmatmul.mubr.msk.f32.gmra.mxu1 %vm520_vm4, %v1098_v20 }
 0x63f   :  { %v1233_v21 = vpop.f32.mrf.mxu1 }
 0x641   :  { %v599_v22 = vpop.f32.mrf.mxu1  ;;  %v1249_v24 = vpop.f32.mrf.mxu0 }
 0x643   :  { %v1236_v9 = vpop.f32.mrf.mxu1  ;;  %v801_v27 = vpop.f32.mrf.mxu0 }
 0x645   :  { %v609_v23 = vpop.f32.mrf.mxu1  ;;  %v1252_v30 = vpop.f32.mrf.mxu0 }
 0x647   :  { %v1241_v25 = vpop.f32.mrf.mxu1  ;;  %v811_v37 = vpop.f32.mrf.mxu0 }
 0x648   :  { %v702_v31 = vadd.f32 %v1241_v25, %v1233_v21 }
 0x649   :  { %v696_v26 = vpop.f32.mrf.mxu1 }
 0x64a   :  { %v697_v35 = vadd.f32 %v696_v26, %v599_v22  ;;  %v821_v39 = vadd.f32 %v1249_v24, %v702_v31 }
 0x64b   :  { %v1244_v28 = vpop.f32.mrf.mxu1 }
 0x64c   :  { %v712_v32 = vadd.f32 %v1244_v28, %v1236_v9  ;;  %v820_v43 = vadd.f32 %v801_v27, %v697_v35 }
 0x64d   :  { %v706_v29 = vpop.f32.mrf.mxu1 }
 0x64e   :  { %v707_v36 = vadd.f32 %v706_v29, %v609_v23  ;;  %v823_v40 = vadd.f32 %v1252_v30, %v712_v32 }
 0x64f   :  { %v1257_v33 = vpop.f32.mrf.mxu1 }
 0x650   :  { %v822_v44 = vadd.f32 %v811_v37, %v707_v36  ;;  %v930_v45 = vadd.f32 %v1257_v33, %v821_v39 }
 0x651   :  { %v910_v38 = vpop.f32.mrf.mxu1 }
 0x652   :  { %v929_v48 = vadd.f32 %v910_v38, %v820_v43  ;;  %v958_v52 = vadd.f32 %v945_v51, %v930_v45 }
 0x653   :  { %v1260_v42 = vpop.f32.mrf.mxu1 }
 0x654   :  { %v932_v46 = vadd.f32 %v1260_v42, %v823_v40  ;;  %v957_v56 = vadd.f32 %v940_v55, %v929_v48  ;;  %v962_v58 = vmax.f32 %v958_v52, 0.0 }
 0x655   :  { %v920_v47 = vpop.f32.mrf.mxu1 }
 0x656   :  { %v960_v49 = vadd.f32 %v955_v34, %v932_v46  ;;  %v931_v50 = vadd.f32 %v920_v47, %v822_v44  ;;  %v961_v59 = vmax.f32 %v957_v56, 0.0 }
 0x658   :  { %v964_v53 = vmax.f32 %v960_v49, 0.0  ;;  %v959_v54 = vadd.f32 %v950_v41, %v931_v50 }
 0x65a   :  { %v963_v57 = vmax.f32 %v959_v54, 0.0  ;;  %1262 = vmatpush3.msra.mxu0 %v964_v53 }
 0x65b   :  { %1263 = vmatprep.subr.mxu0 %v1316_v3 }
 0x65c   :  { %1264 = vmatpush3.msra.mxu0 %v963_v57 }
 0x65d   :  { %1265 = vmatprep.subr.mxu0 %v1316_v3 }
 0x65e   :  { %1266 = vmatpush3.msra.mxu0 %v962_v58 }
 0x65f   :  { %1267 = vmatprep.subr.mxu0 %v1316_v3 }
 0x660   :  { %1268 = vmatpush3.msra.mxu0 %v961_v59 }
 0x661   :  { %1270 = vmatmul.mubr.msk.f32.vlgmr.msra.gmra.mxu0 %vm976_vm5, %v965_v60 }
 0x721   :  { %v1046_v63 = vpop.f32.mrf.mxu0 }
 0x722   :  { %v1047_v0 = vadd.f32 %v1046_v63, %v975_v62 }
 0x723   :  { %v1271_v1 = vpop.f32.mrf.mxu0 }
 0x724   :  { %v1050_v2 = vsub.f32 0.0, %v1047_v0 }
 0x726   :  { %v1051_v4 = vmul.f32 1.442695, %v1050_v2 }
 0x728   :  { %1288 = vpow2.f32 %v1051_v4 }
 0x735   :  { %v1289_v5 = vpop.eup %1288 }
 0x736   :  { %v1053_v6 = vadd.f32 1.0, %v1289_v5 }
 0x738   :  { %1290 = vrcp.f32 %v1053_v6 }
 0x745   :  { %v1291_v7 = vpop.eup %1290 }
 0x746   :  { %1056 = vst.msk [vmem:[#allocation3] sm:$0x1] %vm1055_vm6, %v1291_v7 }
 0x747   :  { %1303 = shalt.err (!%p1300_p4)
}
 0x748   :  { %1066 = dma.vmem_to_hbm [thread:$0]  %s1064_s29, 16, %s1752_s17, [#allocation4]  }
 0x749   :  { %1312 = dma.done.wait [#allocation4], 16  }
 0x74a   :  { %1313 = vsyncadd [#allocation4], 4294967280 }
 0x74b   :  { %1070 = vsyncpa [#allocation4], 1 }

</bundles_post_ra>
